<compile_context>
chip_gen: v7x
topology: tpu7x:2x2x1
jax: 0.10.0
libtpu: 0.0.40
codegen_flags: <defaults>
</compile_context>

<pallas_src>
import jax
import jax.numpy as jnp
from jax.experimental import pallas as pl
from jax.experimental.pallas import tpu as pltpu

NEG_SLOPE = 0.01  # nn.LeakyReLU default negative_slope
IN_DIM = 24


def _round_up(x, m):
    return (x + m - 1) // m * m


def encoder_kernel(x_ref, w1_ref, b1_ref, wh_ref, bh_ref, out_ref):
    # x: (TB, 24); w1: (24, H); b1: (1, H); wh: (H, 2L); bh: (1, 2L)
    x = x_ref[...]
    h = jnp.dot(x, w1_ref[...], preferred_element_type=jnp.float32) + b1_ref[...]
    # LeakyReLU
    h = jnp.where(h > 0, h, NEG_SLOPE * h)
    # Fused mean||logvar head: (TB, H) @ (H, 2L) + (1, 2L)
    out_ref[...] = (jnp.dot(h, wh_ref[...], preferred_element_type=jnp.float32)
                    + bh_ref[...])


def encoder_forward(trajectory, params, *, use_bf16_inputs=False):
    """trajectory: (B, T, 2) with T*2 == 24. Returns (mean, logvar)."""
    B = trajectory.shape[0]
    x = trajectory.reshape(B, -1).astype(jnp.float32)
    assert x.shape[1] == IN_DIM, f"expected {IN_DIM} flattened features, got {x.shape[1]}"

    w1, b1 = params["w1"], params["b1"]
    # Fuse the two heads into one matmul: wh = [wm | wv], bh = [bm | bv].
    wh = jnp.concatenate([params["wm"], params["wv"]], axis=1)
    bh = jnp.concatenate([params["bm"], params["bv"]], axis=1)
    H = w1.shape[1]
    L = params["wm"].shape[1]
    out_dim = 2 * L

    if use_bf16_inputs:
        # Halves input HBM traffic (mainly a v5e/v6e win); loosen tolerances.
        x = x.astype(jnp.bfloat16)
        w1 = w1.astype(jnp.bfloat16)

    # Batch tile: multiple of 8 sublanes, capped well under v7x VMEM budget.
    TB = min(512, _round_up(B, 8))
    B_pad = _round_up(B, TB)
    if B_pad != B:
        x = jnp.pad(x, ((0, B_pad - B), (0, 0)))

    out = pl.pallas_call(
        encoder_kernel,
        out_shape=jax.ShapeDtypeStruct((B_pad, out_dim), jnp.float32),
        grid=(B_pad // TB,),
        in_specs=[
            pl.BlockSpec((TB, IN_DIM), lambda i: (i, 0)),   # x (row-tiled)
            pl.BlockSpec((IN_DIM, H), lambda i: (0, 0)),    # w1 (resident)
            pl.BlockSpec((1, H), lambda i: (0, 0)),         # b1
            pl.BlockSpec((H, out_dim), lambda i: (0, 0)),   # wh (fused heads)
            pl.BlockSpec((1, out_dim), lambda i: (0, 0)),   # bh
        ],
        out_specs=pl.BlockSpec((TB, out_dim), lambda i: (i, 0)),
        compiler_params=pltpu.CompilerParams(
            dimension_semantics=("parallel",)),
    )(x, w1, b1, wh, bh)

    out = out[:B]
    return out[:, :L], out[:, L:]


def init_params(key, hidden_dim, latent_dim):
    """Deterministic synthetic init (Linear layer shapes from __init__)."""
    k1, k2, k3, k4, k5, k6 = jax.random.split(key, 6)
    w1 = jax.random.normal(k1, (IN_DIM, hidden_dim), jnp.float32) * (1.0 / jnp.sqrt(IN_DIM))
    b1 = jax.random.normal(k2, (1, hidden_dim), jnp.float32) * 0.01
    wm = jax.random.normal(k3, (hidden_dim, latent_dim), jnp.float32) * (1.0 / jnp.sqrt(hidden_dim))
    bm = jax.random.normal(k4, (1, latent_dim), jnp.float32) * 0.01
    wv = jax.random.normal(k5, (hidden_dim, latent_dim), jnp.float32) * (1.0 / jnp.sqrt(hidden_dim))
    bv = jax.random.normal(k6, (1, latent_dim), jnp.float32) * 0.01
    return dict(w1=w1, b1=b1, wm=wm, bm=bm, wv=wv, bv=bv)


def encoder_ref(trajectory, params):
    """Pure-JAX reference for correctness check."""
    x = trajectory.reshape(trajectory.shape[0], -1)
    h = x @ params["w1"] + params["b1"]
    h = jnp.where(h > 0, h, NEG_SLOPE * h)
    mean = h @ params["wm"] + params["bm"]
    logvar = h @ params["wv"] + params["bv"]
    return mean, logvar


if __name__ == "__main__":
    key = jax.random.PRNGKey(0)
    k_traj, k_params = jax.random.split(key)

    batch = 8
    hidden_dim = 32
    latent_dim = 8

    # trajectory: (B, 12, 2) -> flattens to (B, 24)
    trajectory = jax.random.normal(k_traj, (batch, 12, 2), jnp.float32)
    params = init_params(k_params, hidden_dim, latent_dim)

    mean, logvar = encoder_forward(trajectory, params)
    jax.block_until_ready((mean, logvar))

    # sanity check against pure-JAX reference
    mean_ref, logvar_ref = encoder_ref(trajectory, params)
    assert mean.shape == (batch, latent_dim) and logvar.shape == (batch, latent_dim)
    assert jnp.allclose(mean, mean_ref, atol=1e-5, rtol=1e-5)
    assert jnp.allclose(logvar, logvar_ref, atol=1e-5, rtol=1e-5)

    print("KERNEL_OK")
</pallas_src>

<mosaic_0001>
module attributes {stable_mosaic.version = 11 : i64} {
  func.func @encoder_kernel(%arg0: i32, %arg1: memref<8x24xf32, #tpu.memory_space<vmem>>, %arg2: memref<24x32xf32, #tpu.memory_space<vmem>>, %arg3: memref<1x32xf32, #tpu.memory_space<vmem>>, %arg4: memref<32x16xf32, #tpu.memory_space<vmem>>, %arg5: memref<1x16xf32, #tpu.memory_space<vmem>>, %arg6: memref<8x16xf32, #tpu.memory_space<vmem>>) attributes {dimension_semantics = [#tpu.dimension_semantics<parallel>], iteration_bounds = array<i64: 1>, scalar_prefetch = 0 : i64, scratch_operands = 0 : i64, tpu.core_type = #tpu.core_type<tc>, window_params = [{transform_indices = @transform_0, window_bounds = array<i64: 8, 24>}, {pipeline_mode = #tpu.pipeline_mode<synchronous>, transform_indices = @transform_1, window_bounds = array<i64: 24, 32>}, {pipeline_mode = #tpu.pipeline_mode<synchronous>, transform_indices = @transform_2, window_bounds = array<i64: 1, 32>}, {pipeline_mode = #tpu.pipeline_mode<synchronous>, transform_indices = @transform_3, window_bounds = array<i64: 32, 16>}, {pipeline_mode = #tpu.pipeline_mode<synchronous>, transform_indices = @transform_4, window_bounds = array<i64: 1, 16>}, {transform_indices = @transform_5, window_bounds = array<i64: 8, 16>}]} {
    %c0 = arith.constant 0 : index
    %c0_0 = arith.constant 0 : index
    %0 = vector.load %arg1[%c0, %c0_0] : memref<8x24xf32, #tpu.memory_space<vmem>>, vector<8x24xf32>
    %c0_1 = arith.constant 0 : index
    %c0_2 = arith.constant 0 : index
    %1 = vector.load %arg2[%c0_1, %c0_2] : memref<24x32xf32, #tpu.memory_space<vmem>>, vector<24x32xf32>
    %cst = arith.constant dense<0.000000e+00> : vector<8x32xf32>
    %2 = tpu.matmul %0, %1, %cst {dimension_numbers = #tpu.dot_dimension_numbers<[1], [0], [0], [1], [0, 0, 1, 1], [], []>} : vector<8x24xf32>, vector<24x32xf32>, vector<8x32xf32> -> vector<8x32xf32>
    %c0_3 = arith.constant 0 : index
    %c0_4 = arith.constant 0 : index
    %3 = vector.load %arg3[%c0_3, %c0_4] : memref<1x32xf32, #tpu.memory_space<vmem>>, vector<1x32xf32>
    %4 = vector.broadcast %3 : vector<1x32xf32> to vector<8x32xf32>
    %5 = arith.addf %2, %4 : vector<8x32xf32>
    %cst_5 = arith.constant 0.000000e+00 : f32
    %6 = vector.broadcast %cst_5 : f32 to vector<8x32xf32>
    %7 = arith.cmpf ogt, %5, %6 : vector<8x32xf32>
    %cst_6 = arith.constant 0.00999999977 : f32
    %8 = vector.broadcast %cst_6 : f32 to vector<8x32xf32>
    %9 = arith.mulf %8, %5 : vector<8x32xf32>
    %10 = arith.select %7, %5, %9 : vector<8x32xi1>, vector<8x32xf32>
    %c0_7 = arith.constant 0 : index
    %c0_8 = arith.constant 0 : index
    %11 = vector.load %arg4[%c0_7, %c0_8] : memref<32x16xf32, #tpu.memory_space<vmem>>, vector<32x16xf32>
    %cst_9 = arith.constant dense<0.000000e+00> : vector<8x16xf32>
    %12 = tpu.matmul %10, %11, %cst_9 {dimension_numbers = #tpu.dot_dimension_numbers<[1], [0], [0], [1], [0, 0, 1, 1], [], []>} : vector<8x32xf32>, vector<32x16xf32>, vector<8x16xf32> -> vector<8x16xf32>
    %c0_10 = arith.constant 0 : index
    %c0_11 = arith.constant 0 : index
    %13 = vector.load %arg5[%c0_10, %c0_11] : memref<1x16xf32, #tpu.memory_space<vmem>>, vector<1x16xf32>
    %14 = vector.broadcast %13 : vector<1x16xf32> to vector<8x16xf32>
    %15 = arith.addf %12, %14 : vector<8x16xf32>
    %c0_12 = arith.constant 0 : index
    %c0_13 = arith.constant 0 : index
    %16 = vector.load %arg6[%c0_12, %c0_13] : memref<8x16xf32, #tpu.memory_space<vmem>>, vector<8x16xf32>
    tpu.vector_store %arg6[%c0_12, %c0_13], %15 {strides = array<i32>} : memref<8x16xf32, #tpu.memory_space<vmem>>, vector<8x16xf32>,
    return
  }
  func.func @transform_0(%arg0: i32) -> (i32, i32) {
    %c0_i32 = arith.constant 0 : i32
    %c0_i32_0 = arith.constant 0 : i32
    return %arg0, %c0_i32 : i32, i32
  }
  func.func @transform_1(%arg0: i32) -> (i32, i32) {
    %c0_i32 = arith.constant 0 : i32
    %c0_i32_0 = arith.constant 0 : i32
    %c0_i32_1 = arith.constant 0 : i32
    return %c0_i32, %c0_i32_0 : i32, i32
  }
  func.func @transform_2(%arg0: i32) -> (i32, i32) {
    %c0_i32 = arith.constant 0 : i32
    %c0_i32_0 = arith.constant 0 : i32
    %c0_i32_1 = arith.constant 0 : i32
    return %c0_i32, %c0_i32_0 : i32, i32
  }
  func.func @transform_3(%arg0: i32) -> (i32, i32) {
    %c0_i32 = arith.constant 0 : i32
    %c0_i32_0 = arith.constant 0 : i32
    %c0_i32_1 = arith.constant 0 : i32
    return %c0_i32, %c0_i32_0 : i32, i32
  }
  func.func @transform_4(%arg0: i32) -> (i32, i32) {
    %c0_i32 = arith.constant 0 : i32
    %c0_i32_0 = arith.constant 0 : i32
    %c0_i32_1 = arith.constant 0 : i32
    return %c0_i32, %c0_i32_0 : i32, i32
  }
  func.func @transform_5(%arg0: i32) -> (i32, i32) {
    %c0_i32 = arith.constant 0 : i32
    %c0_i32_0 = arith.constant 0 : i32
    return %arg0, %c0_i32 : i32, i32
  }
}

</mosaic_0001>

<bundles_post_ra>
// kernel: tpu_custom_call.1
= control target key start
LH: loop header
LB: loop body
LE: loop exit
PB: predicated region body
PF: predicated region fallthrough
CT: control target
= control target key end

     0   :  { %v280_v2 = vmov 0.0|0.0   ;;  %vm281_vm0 = vmmov 0   ;;  %v282_v4 = vmov 0.0   ;;  %s356_s0 = inlined_call_operand.vmem [shape: f32[8,24], index: 0, kind: input, shape index: {}]   ;;  %s357_s1 = inlined_call_operand.vmem [shape: f32[24,32], index: 1, kind: input, shape index: {}]   ;;  %s358_s2 = inlined_call_operand.vmem [shape: f32[1,32], index: 2, kind: input, shape index: {}]   ;;  %s359_s3 = inlined_call_operand.vmem [shape: f32[32,16], index: 3, kind: input, shape index: {}]   ;;  %s360_s4 = inlined_call_operand.vmem [shape: f32[1,16], index: 4, kind: input, shape index: {}]   ;;  %s361_s5 = inlined_call_operand.hbm [shape: f32[8,16], index: 5, kind: output, shape index: {}]  }
   0x1   :  { %v22_v0 = vld [vmem:[%s357_s1] sm:$0xff]  ;;  %v23_v1 = vld [vmem:[%s357_s1 + $0x8] sm:$0xff]  ;;  %243 = vmatprep.subr.bf16.mxu0 %v280_v2  ;;  %229 = vmatprep.mubr.msk.f32.mxu0 %vm281_vm0, %v282_v4 }
   0x2   :  { %v244_v3 = vpack.c.bf16 %v23_v1, %v22_v0  ;;  %v109_v5 = vld [vmem:[%s359_s3] sm:$0xff]  ;;  %v110_v6 = vld [vmem:[%s359_s3 + $0x8] sm:$0xff]  ;;  %246 = vmatprep.subr.bf16.mxu1 %v280_v2  ;;  %240 = vmatprep.mubr.msk.f32.mxu1 %vm281_vm0, %v282_v4 }
   0x3   :  { %v247_v7 = vpack.c.bf16 %v110_v6, %v109_v5 }
   0x4   :  { %10 = vsyncpa [#allocation3], 0  ;;  %245 = vmatpush3.bf16.msra.mxu0 %v244_v3  ;;  %v24_v8 = vld [vmem:[%s357_s1 + $0x10] sm:$0xff]  ;;  %v21_v9 = vld [vmem:[%s356_s0] sm:$0xff]  ;;  %vm32_vm1 = vcmask 195584   ;;  %vm120_vm3 = vcmask 261120  }
   0x5   :  { %227 = vmatprep.subr.mxu0 %v282_v4  ;;  %248 = vmatpush3.bf16.msra.mxu1 %v247_v7  ;;  %v111_v10 = vld [vmem:[%s359_s3 + $0x10] sm:$0xff]  ;;  %v112_v11 = vld [vmem:[%s359_s3 + $0x18] sm:$0xff]  ;;  %v210_v13 = vld [vmem:[%s358_s2] ss:$0 sm:$0xff]  ;;  %s283_s11 = smov [#allocation2]   ;;  %vm194_vm4 = vcmask 130048  }
   0x6   :  { %249 = vmatprep.subr.bf16.mxu1 %v280_v2  ;;  %v250_v12 = vpack.c.bf16 %v112_v11, %v111_v10  ;;  %v212_v19 = vld [vmem:[%s360_s4] ss:$0 sm:$0xff]  ;;  %s202_s3 = sshll.u32 %s283_s11, 4  ;;  %s203_s3 = int_to_ptr.vmem [resolvable:$true] %s202_s3 }
   0x7   :  { %s256_s2 = scalar_lea.vmem %s203_s3, 128  ;;  %p261_p1 = scmp.lt.s32.totalorder %s203_s3, %s203_s3 }
   0x8   :  { %228 = vmatpush3.msra.mxu0 %v24_v8  ;;  %p257_p0 = scmp.ne.s32.totalorder %s203_s3, %s256_s2  ;;  %p262_p2 = scmp.lt.s32.totalorder %s256_s2, %s256_s2 }
   0x9   :  { %230 = vmatmul.mubr.msk.f32.vlgmr.msra.gmra.mrb[0].mxu0 %vm32_vm1, %v21_v9  ;;  %251 = vmatpush3.bf16.msra.mxu1 %v250_v12 }
   0xa   :  { %p263_p3 = por %p262_p2, %p261_p1 }
   0xc   :  { %p264_p4 = pnand %p263_p3, %p257_p0 }
  0xdc   :  { %v102_v14 = vpop.f32.mrb[0].mxu0 }
  0xdd   :  { %v103_v15 = vadd.f32 %v210_v13, %v102_v14  ;;  %v231_v16 = vpop.f32.mrb[1].mxu0 }
  0xdf   :  { %vm106_vm2 = vcmp.gt.f32.partialorder %v103_v15, 0.0  ;;  %v107_v17 = vmul.f32 0.01, %v103_v15 }
  0xe1   :  { %v108_v18 = vsel %vm106_vm2, %v103_v15, %v107_v17 }
  0xe2   :  { %241 = vmatmul.mubr.msk.f32.vlgmr.msra.gmra.mrb[0].mxu1 %vm120_vm3, %v108_v18 }
 0x1b5   :  { %v190_v20 = vpop.f32.mrb[0].mxu1 }
 0x1b6   :  { %v191_v21 = vadd.f32 %v212_v19, %v190_v20  ;;  %v242_v22 = vpop.f32.mrb[1].mxu1 }
 0x1b8   :  { %195 = vst.msk [vmem:[#allocation2] sm:$0xff] %vm194_vm4, %v191_v21 }
 0x1b9   :  { %267 = shalt.err (!%p264_p4)
}
 0x1ba   :  { %s268_s14 = scalar_lea.hbm %s361_s5, 128 }
 0x1bb   :  { %p269_p5 = scmp.ne.s32.totalorder %s361_s5, %s268_s14  ;;  %p272_p6 = scmp.lt.u32.totalorder %s268_s14, %s361_s5 }
 0x1bd   :  { %p274_p7 = pnand %p272_p6, %p269_p5 }
 0x1bf   :  { %277 = shalt.err (!%p274_p7)
}
 0x1c0   :  { %205 = dma.vmem_to_hbm [thread:$0]  %s203_s3, 128, %s361_s5, [#allocation3]  }
 0x1c1   :  { %278 = dma.done.wait [#allocation3], 128  }
 0x1c2   :  { %279 = vsyncadd [#allocation3], 4294967168 }
 0x1c3   :  { %209 = vsyncpa [#allocation3], 1 }

</bundles_post_ra>
